<compile_context>
chip_gen: v5e
topology: v5e:2x2
jax: 0.10.0
libtpu: 0.0.40
codegen_flags: <defaults>
</compile_context>

<pallas_src>
import functools

import jax
import jax.numpy as jnp
from jax.experimental import pallas as pl
from jax.experimental.pallas import tpu as pltpu


def _round_up(x, m):
    return ((x + m - 1) // m) * m


def _nfm_kernel(num_front, ue_ref, ie_ref, bias_ref, *refs):
    """One batch tile of the NFM forward.

    ue_ref, ie_ref : (TM, Dp)  gathered user/item embeddings (zero-padded cols)
    bias_ref       : (1, TM)   linear-term bias, batch in the lane dim
    if num_front>0 : wf_ref (num_front, Dp, Dp) pre-transposed (in, out)
                     bf_ref (num_front, 1, Dp)
    always         : wl_ref (Dp, Dp) last Linear in PyTorch (out, in) layout
                     blT_ref (Dp, 1) last-layer bias as a column
                     out_ref (1, TM)
    """
    if num_front > 0:
        wf_ref, bf_ref, wl_ref, blT_ref, out_ref = refs
    else:
        wl_ref, blT_ref, out_ref = refs

    # Interaction embedding.
    x = ue_ref[...] * ie_ref[...]                                   # (TM, Dp)

    # All layers but the last: ReLU -> x @ W + b  (static unroll, MXU matmuls).
    for l in range(num_front):
        x = jnp.maximum(x, 0.0)
        x = jnp.dot(x, wf_ref[l], preferred_element_type=jnp.float32) + bf_ref[l]

    # Last layer, computed transposed (W_last @ x^T) so the per-row result ends
    # up with batch in the lane dimension -> lane-dense reduce + output store.
    x = jnp.maximum(x, 0.0)
    yT = jax.lax.dot_general(
        wl_ref[...], x, (((1,), (1,)), ((), ())),
        preferred_element_type=jnp.float32)                         # (Dp, TM)
    yT = jnp.maximum(yT + blT_ref[...], 0.0)                        # final ReLU

    logits = jnp.sum(yT, axis=0, keepdims=True) + bias_ref[...]     # (1, TM)
    out_ref[...] = jax.nn.sigmoid(logits)


def pad_params_for_tpu(params, lane=128):
    """Zero-pad the feature dim to a lane multiple and pre-arrange weights.

    Padded weight rows/cols, padded biases and padded embedding columns are all
    zero, so ReLU / row-sum results are bit-identical to the unpadded model.
    """
    D = params["user_embed"].shape[1]
    L = params["w_stack"].shape[0]
    if L < 1:
        # TODO(synk): layer_size == 0 degenerate config not handled by the kernel.
        raise ValueError("pad_params_for_tpu requires layer_size >= 1")
    Dp = max(lane, _round_up(D, lane))
    pad = Dp - D

    def pad_cols(a):
        return jnp.pad(a, ((0, 0), (0, pad)))

    w_stack = params["w_stack"]          # (L, D, D), already (in, out)
    b_stack = params["b_stack"]          # (L, 1, D)

    return {
        "user_embed": pad_cols(params["user_embed"]).astype(jnp.float32),
        "item_embed": pad_cols(params["item_embed"]).astype(jnp.float32),
        "user_lin": params["user_lin"].astype(jnp.float32),
        "item_lin": params["item_lin"].astype(jnp.float32),
        # First L-1 layers, (in, out) orientation, zero-padded.
        "w_front": jnp.pad(w_stack[:-1], ((0, 0), (0, pad), (0, pad))).astype(jnp.float32),
        "b_front": jnp.pad(b_stack[:-1], ((0, 0), (0, 0), (0, pad))).astype(jnp.float32),
        # Last layer back in PyTorch (out, in) orientation; bias as a column.
        "w_last": jnp.pad(jnp.transpose(w_stack[-1]), ((0, pad), (0, pad))).astype(jnp.float32),
        "b_lastT": jnp.pad(jnp.transpose(b_stack[-1]), ((0, pad), (0, 0))).astype(jnp.float32),
        "embedding_dim": D,
        "d_pad": Dp,
        "layer_size": L,
    }


def nfm_forward(user_tensor, item_tensor, padded_params, *, tile_m=256):
    """Pallas-backed NFM forward. Returns prob with shape (B,)."""
    p = padded_params
    Dp = p["d_pad"]
    L = p["layer_size"]
    num_front = L - 1

    B = int(user_tensor.shape[0])
    # Batch tile: 256 on v6e/v7x-sized problems; shrink (multiple of 8) for tiny B.
    TM = tile_m if B > tile_m else max(8, _round_up(B, 8))
    B_pad = _round_up(B, TM)
    num_tiles = B_pad // TM

    # Pad indices so the padded tail gathers valid rows (results sliced off).
    upad = jnp.pad(user_tensor, (0, B_pad - B))
    ipad = jnp.pad(item_tensor, (0, B_pad - B))

    # Embedding lookups (gather) -- XLA glue.
    # TODO(synk): fuse gathers into the kernel via scalar prefetch + manual DMA.
    ue = jnp.take(p["user_embed"], upad, axis=0)                 # (B_pad, Dp)
    ie = jnp.take(p["item_embed"], ipad, axis=0)                 # (B_pad, Dp)
    lin = (jnp.take(p["user_lin"], upad, axis=0)
           + jnp.take(p["item_lin"], ipad, axis=0))[:, 0]        # (B_pad,)
    lin = lin.reshape(num_tiles, 1, TM)                          # batch in lanes

    kernel = functools.partial(_nfm_kernel, num_front)

    in_specs = [
        pl.BlockSpec((TM, Dp), lambda i: (i, 0)),                # ue tile
        pl.BlockSpec((TM, Dp), lambda i: (i, 0)),                # ie tile
        pl.BlockSpec((None, 1, TM), lambda i: (i, 0, 0)),        # bias, lane-dense
    ]
    operands = [ue, ie, lin]
    if num_front > 0:
        in_specs += [
            pl.BlockSpec((num_front, Dp, Dp), lambda i: (0, 0, 0)),  # resident
            pl.BlockSpec((num_front, 1, Dp), lambda i: (0, 0, 0)),   # resident
        ]
        operands += [p["w_front"], p["b_front"]]
    in_specs += [
        pl.BlockSpec((Dp, Dp), lambda i: (0, 0)),                # w_last resident
        pl.BlockSpec((Dp, 1), lambda i: (0, 0)),                 # b_last^T resident
    ]
    operands += [p["w_last"], p["b_lastT"]]

    # Explicit VMEM budget: resident weights + double-buffered activation tiles.
    itemsize = 4
    w_bytes = (num_front * Dp * Dp + num_front * Dp + Dp * Dp + Dp) * itemsize
    act_bytes = 2 * 2 * TM * Dp * itemsize           # ue + ie, double-buffered
    io_bytes = 2 * 2 * 2 * TM * itemsize             # bias + out, double-buffered
    vmem_limit = int(min(100 * 2**20,
                         max(32 * 2**20,
                             2 * w_bytes + act_bytes + io_bytes + (4 << 20))))

    flops = 2 * B_pad * L * Dp * Dp + 6 * B_pad * Dp
    bytes_accessed = w_bytes + 2 * B_pad * Dp * itemsize + 3 * B_pad * itemsize

    out = pl.pallas_call(
        kernel,
        out_shape=jax.ShapeDtypeStruct((num_tiles, 1, TM), jnp.float32),
        grid=(num_tiles,),
        in_specs=in_specs,
        out_specs=pl.BlockSpec((None, 1, TM), lambda i: (i, 0, 0)),
        compiler_params=pltpu.CompilerParams(
            dimension_semantics=("parallel",),
            vmem_limit_bytes=vmem_limit),
        cost_estimate=pl.CostEstimate(flops=flops,
                                      transcendentals=B_pad,
                                      bytes_accessed=bytes_accessed),
    )(*operands)

    return out.reshape(-1)[:B]                                   # (B,)


def nfm_reference(user_tensor, item_tensor, params):
    """Pure-JAX reference matching the PyTorch forward semantics (unpadded)."""
    ue = jnp.take(params["user_embed"], user_tensor, axis=0)
    ie = jnp.take(params["item_embed"], item_tensor, axis=0)
    x = ue * ie
    L = params["w_stack"].shape[0]
    for i in range(L):
        x = jnp.maximum(x, 0.0)
        x = x @ params["w_stack"][i] + params["b_stack"][i]
    x = jnp.maximum(x, 0.0)
    bias = (jnp.take(params["user_lin"], user_tensor, axis=0)
            + jnp.take(params["item_lin"], item_tensor, axis=0))[:, 0]
    return jax.nn.sigmoid(jnp.sum(x, axis=1) + bias)


def init_params(key, embedding_dim, user_size, item_size, layer_size):
    ks = jax.random.split(key, 6)
    user_embed = jax.random.normal(ks[0], (user_size, embedding_dim), jnp.float32)
    item_embed = jax.random.normal(ks[1], (item_size, embedding_dim), jnp.float32)
    user_lin = jax.random.normal(ks[2], (user_size, 1), jnp.float32)
    item_lin = jax.random.normal(ks[3], (item_size, 1), jnp.float32)
    bound = 1.0 / jnp.sqrt(embedding_dim)
    # PyTorch Linear weight is (out, in); store pre-transposed (in, out).
    w_pt = jax.random.uniform(ks[4], (layer_size, embedding_dim, embedding_dim),
                              jnp.float32, -bound, bound)
    w_stack = jnp.transpose(w_pt, (0, 2, 1))
    b_stack = jax.random.uniform(ks[5], (layer_size, 1, embedding_dim),
                                 jnp.float32, -bound, bound)
    return {
        "user_embed": user_embed,
        "item_embed": item_embed,
        "user_lin": user_lin,
        "item_lin": item_lin,
        "w_stack": w_stack,
        "b_stack": b_stack,
    }


if __name__ == "__main__":
    embedding_dim = 32
    user_size = 10
    item_size = 12
    layer_size = 2
    batch = 8

    key = jax.random.PRNGKey(0)
    pkey, ukey, ikey = jax.random.split(key, 3)
    params = init_params(pkey, embedding_dim, user_size, item_size, layer_size)
    padded_params = pad_params_for_tpu(params)

    user_tensor = jax.random.randint(ukey, (batch,), 0, user_size, jnp.int32)
    item_tensor = jax.random.randint(ikey, (batch,), 0, item_size, jnp.int32)

    prob = nfm_forward(user_tensor, item_tensor, padded_params)
    prob = jax.block_until_ready(prob)

    ref = nfm_reference(user_tensor, item_tensor, params)
    assert prob.shape == (batch,)
    assert jnp.allclose(prob, ref, atol=1e-5, rtol=1e-5), (prob, ref)

    print("KERNEL_OK")
</pallas_src>

<mosaic_0001>
module attributes {stable_mosaic.version = 11 : i64} {
  func.func @_nfm_kernel(%arg0: i32, %arg1: memref<8x128xf32, #tpu.memory_space<vmem>>, %arg2: memref<8x128xf32, #tpu.memory_space<vmem>>, %arg3: memref<1x1x8xf32, #tpu.memory_space<vmem>>, %arg4: memref<1x128x128xf32, #tpu.memory_space<vmem>>, %arg5: memref<1x1x128xf32, #tpu.memory_space<vmem>>, %arg6: memref<128x128xf32, #tpu.memory_space<vmem>>, %arg7: memref<128x1xf32, #tpu.memory_space<vmem>>, %arg8: memref<1x1x8xf32, #tpu.memory_space<vmem>>) attributes {dimension_semantics = [#tpu.dimension_semantics<parallel>], iteration_bounds = array<i64: 1>, scalar_prefetch = 0 : i64, scratch_operands = 0 : i64, tpu.core_type = #tpu.core_type<tc>, window_params = [{transform_indices = @transform_0, window_bounds = array<i64: 8, 128>}, {transform_indices = @transform_1, window_bounds = array<i64: 8, 128>}, {transform_indices = @transform_2, window_bounds = array<i64: 1, 1, 8>}, {pipeline_mode = #tpu.pipeline_mode<synchronous>, transform_indices = @transform_3, window_bounds = array<i64: 1, 128, 128>}, {pipeline_mode = #tpu.pipeline_mode<synchronous>, transform_indices = @transform_4, window_bounds = array<i64: 1, 1, 128>}, {pipeline_mode = #tpu.pipeline_mode<synchronous>, transform_indices = @transform_5, window_bounds = array<i64: 128, 128>}, {pipeline_mode = #tpu.pipeline_mode<synchronous>, transform_indices = @transform_6, window_bounds = array<i64: 128, 1>}, {transform_indices = @transform_7, window_bounds = array<i64: 1, 1, 8>}]} {
    %c0 = arith.constant 0 : index
    %c0_0 = arith.constant 0 : index
    %0 = vector.load %arg1[%c0, %c0_0] : memref<8x128xf32, #tpu.memory_space<vmem>>, vector<8x128xf32>
    %c0_1 = arith.constant 0 : index
    %c0_2 = arith.constant 0 : index
    %1 = vector.load %arg2[%c0_1, %c0_2] : memref<8x128xf32, #tpu.memory_space<vmem>>, vector<8x128xf32>
    %2 = arith.mulf %0, %1 : vector<8x128xf32>
    %cst = arith.constant 0.000000e+00 : f32
    %3 = vector.broadcast %cst : f32 to vector<8x128xf32>
    %4 = arith.maximumf %2, %3 : vector<8x128xf32>
    %c0_3 = arith.constant 0 : index
    %c0_4 = arith.constant 0 : index
    %c0_5 = arith.constant 0 : index
    %5 = vector.load %arg4[%c0_3, %c0_4, %c0_5] : memref<1x128x128xf32, #tpu.memory_space<vmem>>, vector<1x128x128xf32>
    %6 = vector.shape_cast %5 : vector<1x128x128xf32> to vector<128x128xf32>
    %cst_6 = arith.constant dense<0.000000e+00> : vector<8x128xf32>
    %7 = tpu.matmul %4, %6, %cst_6 {dimension_numbers = #tpu.dot_dimension_numbers<[1], [0], [0], [1], [0, 0, 1, 1], [], []>} : vector<8x128xf32>, vector<128x128xf32>, vector<8x128xf32> -> vector<8x128xf32>
    %c0_7 = arith.constant 0 : index
    %c0_8 = arith.constant 0 : index
    %c0_9 = arith.constant 0 : index
    %8 = vector.load %arg5[%c0_7, %c0_8, %c0_9] : memref<1x1x128xf32, #tpu.memory_space<vmem>>, vector<1x1x128xf32>
    %9 = vector.shape_cast %8 : vector<1x1x128xf32> to vector<1x128xf32>
    %10 = vector.broadcast %9 : vector<1x128xf32> to vector<8x128xf32>
    %11 = arith.addf %7, %10 : vector<8x128xf32>
    %cst_10 = arith.constant 0.000000e+00 : f32
    %12 = vector.broadcast %cst_10 : f32 to vector<8x128xf32>
    %13 = arith.maximumf %11, %12 : vector<8x128xf32>
    %c0_11 = arith.constant 0 : index
    %c0_12 = arith.constant 0 : index
    %14 = vector.load %arg6[%c0_11, %c0_12] : memref<128x128xf32, #tpu.memory_space<vmem>>, vector<128x128xf32>
    %cst_13 = arith.constant dense<0.000000e+00> : vector<128x8xf32>
    %15 = tpu.matmul %14, %13, %cst_13 {dimension_numbers = #tpu.dot_dimension_numbers<[1], [1], [0], [0], [0, 0, 1, 0], [], []>} : vector<128x128xf32>, vector<8x128xf32>, vector<128x8xf32> -> vector<128x8xf32>
    %c0_14 = arith.constant 0 : index
    %c0_15 = arith.constant 0 : index
    %16 = vector.load %arg7[%c0_14, %c0_15] : memref<128x1xf32, #tpu.memory_space<vmem>>, vector<128x1xf32>
    %17 = vector.broadcast %16 : vector<128x1xf32> to vector<128x8xf32>
    %18 = arith.addf %15, %17 : vector<128x8xf32>
    %cst_16 = arith.constant 0.000000e+00 : f32
    %19 = vector.broadcast %cst_16 : f32 to vector<128x8xf32>
    %20 = arith.maximumf %18, %19 : vector<128x8xf32>
    %cst_17 = arith.constant dense<0.000000e+00> : vector<8xf32>
    %21 = vector.multi_reduction <add>, %20, %cst_17 [0] : vector<128x8xf32> to vector<8xf32>
    %22 = vector.shape_cast %21 : vector<8xf32> to vector<1x8xf32>
    %c0_18 = arith.constant 0 : index
    %c0_19 = arith.constant 0 : index
    %c0_20 = arith.constant 0 : index
    %23 = vector.load %arg3[%c0_18, %c0_19, %c0_20] : memref<1x1x8xf32, #tpu.memory_space<vmem>>, vector<1x1x8xf32>
    %24 = vector.shape_cast %23 : vector<1x1x8xf32> to vector<1x8xf32>
    %25 = arith.addf %22, %24 : vector<1x8xf32>
    %26 = arith.negf %25 : vector<1x8xf32>
    %27 = math.exp %26 : vector<1x8xf32>
    %cst_21 = arith.constant 1.000000e+00 : f32
    %28 = vector.broadcast %cst_21 : f32 to vector<1x8xf32>
    %29 = arith.addf %28, %27 : vector<1x8xf32>
    %30 = arith.divf %28, %29 : vector<1x8xf32>
    %c0_22 = arith.constant 0 : index
    %c0_23 = arith.constant 0 : index
    %c0_24 = arith.constant 0 : index
    %31 = vector.load %arg8[%c0_22, %c0_23, %c0_24] : memref<1x1x8xf32, #tpu.memory_space<vmem>>, vector<1x1x8xf32>
    %32 = vector.shape_cast %31 : vector<1x1x8xf32> to vector<1x8xf32>
    %33 = vector.shape_cast %30 : vector<1x8xf32> to vector<1x1x8xf32>
    tpu.vector_store %arg8[%c0_22, %c0_23, %c0_24], %33 {strides = array<i32>} : memref<1x1x8xf32, #tpu.memory_space<vmem>>, vector<1x1x8xf32>,
    return
  }
  func.func @transform_0(%arg0: i32) -> (i32, i32) {
    %c0_i32 = arith.constant 0 : i32
    %c0_i32_0 = arith.constant 0 : i32
    return %arg0, %c0_i32 : i32, i32
  }
  func.func @transform_1(%arg0: i32) -> (i32, i32) {
    %c0_i32 = arith.constant 0 : i32
    %c0_i32_0 = arith.constant 0 : i32
    return %arg0, %c0_i32 : i32, i32
  }
  func.func @transform_2(%arg0: i32) -> (i32, i32, i32) {
    %c0_i32 = arith.constant 0 : i32
    %c0_i32_0 = arith.constant 0 : i32
    %c0_i32_1 = arith.constant 0 : i32
    return %arg0, %c0_i32, %c0_i32_0 : i32, i32, i32
  }
  func.func @transform_3(%arg0: i32) -> (i32, i32, i32) {
    %c0_i32 = arith.constant 0 : i32
    %c0_i32_0 = arith.constant 0 : i32
    %c0_i32_1 = arith.constant 0 : i32
    %c0_i32_2 = arith.constant 0 : i32
    return %c0_i32, %c0_i32_0, %c0_i32_1 : i32, i32, i32
  }
  func.func @transform_4(%arg0: i32) -> (i32, i32, i32) {
    %c0_i32 = arith.constant 0 : i32
    %c0_i32_0 = arith.constant 0 : i32
    %c0_i32_1 = arith.constant 0 : i32
    %c0_i32_2 = arith.constant 0 : i32
    return %c0_i32, %c0_i32_0, %c0_i32_1 : i32, i32, i32
  }
  func.func @transform_5(%arg0: i32) -> (i32, i32) {
    %c0_i32 = arith.constant 0 : i32
    %c0_i32_0 = arith.constant 0 : i32
    %c0_i32_1 = arith.constant 0 : i32
    return %c0_i32, %c0_i32_0 : i32, i32
  }
  func.func @transform_6(%arg0: i32) -> (i32, i32) {
    %c0_i32 = arith.constant 0 : i32
    %c0_i32_0 = arith.constant 0 : i32
    %c0_i32_1 = arith.constant 0 : i32
    return %c0_i32, %c0_i32_0 : i32, i32
  }
  func.func @transform_7(%arg0: i32) -> (i32, i32, i32) {
    %c0_i32 = arith.constant 0 : i32
    %c0_i32_0 = arith.constant 0 : i32
    %c0_i32_1 = arith.constant 0 : i32
    return %arg0, %c0_i32, %c0_i32_0 : i32, i32, i32
  }
}

</mosaic_0001>

<bundles_post_ra>
// kernel: tpu_custom_call.1
= control target key start
LH: loop header
LB: loop body
LE: loop exit
PB: predicated region body
PF: predicated region fallthrough
CT: control target
= control target key end

     0   :  { %12 = vsyncpa [#allocation3], 0  ;;  %s684_s0 = inlined_call_operand.hbm [shape: f32[8,128], index: 0, kind: input, shape index: {}]   ;;  %s685_s1 = inlined_call_operand.hbm [shape: f32[8,128], index: 1, kind: input, shape index: {}]   ;;  %s686_s2 = inlined_call_operand.vmem [shape: f32[1,1,8], index: 2, kind: input, shape index: {}]   ;;  %s687_s3 = inlined_call_operand.vmem [shape: f32[1,128,128], index: 3, kind: input, shape index: {}]   ;;  %s688_s4 = inlined_call_operand.vmem [shape: f32[1,1,128], index: 4, kind: input, shape index: {}]   ;;  %s689_s5 = inlined_call_operand.hbm [shape: f32[128,128], index: 5, kind: input, shape index: {}]   ;;  %s690_s6 = inlined_call_operand.vmem [shape: f32[128,1], index: 6, kind: input, shape index: {}]   ;;  %s691_s7 = inlined_call_operand.hbm [shape: f32[1,1,8], index: 7, kind: output, shape index: {}]  }
   0x1   :  { %13 = vsyncpa [#allocation6], 0  ;;  %s31_s26 = sshll.u32 %s685_s1, 4  ;;  %s32_s26 = int_to_ptr.hbm [resolvable:$true] %s31_s26 }
   0x2   :  { %14 = vsyncpa [#allocation4], 0  ;;  %s507_s27 = smov [#allocation5]   ;;  %s20_s8 = sshll.u32 %s684_s0, 4  ;;  %s21_s8 = int_to_ptr.hbm [resolvable:$true] %s20_s8 }
   0x3   :  { %s33_s28 = sshll.u32 %s507_s27, 4  ;;  %s508_s9 = smov [#allocation2]   ;;  %s34_s28 = int_to_ptr.vmem [resolvable:$true] %s33_s28 }
   0x4   :  { %36 = dma.hbm_to_vmem [thread:$0]  %s32_s26, 128, %s34_s28, [#allocation6]  }
   0x5   :  { %s22_s10 = sshll.u32 %s508_s9, 4  ;;  %s47_s13 = sshll.u32 %s689_s5, 4  ;;  %s23_s10 = int_to_ptr.vmem [resolvable:$true] %s22_s10  ;;  %s48_s13 = int_to_ptr.hbm [resolvable:$true] %s47_s13 }
   0x6   :  { %25 = dma.hbm_to_vmem [thread:$0]  %s21_s8, 128, %s23_s10, [#allocation3]  }
   0x7   :  { %s509_s1 = smov [#allocation7]   ;;  %s510_s15 = smov 128  }
   0x8   :  { %s49_s14 = sshll.u32 %s509_s1, 4  ;;  %s511_s16 = smov 8   ;;  %s50_s14 = int_to_ptr.vmem [resolvable:$true] %s49_s14 }
   0x9   :  { %55 = dma.hbm_to_vmem [thread:$0]  %s48_s13, 2048, %s50_s14, [#allocation6], %s510_s15, %s510_s15, %s511_s16  }
   0xa   :  { %501 = dma.done.wait [#allocation3], 128  }
   0xb   :  { %502 = vsyncadd [#allocation3], 4294967168 }
   0xc   :  { %503 = dma.done.wait [#allocation6], 2176  }
   0xd   :  { %504 = vsyncadd [#allocation6], 4294965120  ;;  %v89_v0 = vld [vmem:[%s687_s3 + $0x78] sm:$0xff]  ;;  %v88_v1 = vld [vmem:[%s687_s3 + $0x70] sm:$0xff]  ;;  %v512_v2 = vmov 0   ;;  %vm308_vm0 = vcmask 64512  }
   0xe   :  { %94 = vmatpush.msra.mxu0 %v89_v0  ;;  %397 = vset.pattern.permute.xlu0 %v512_v2  ;;  %v87_v3 = vld [vmem:[%s687_s3 + $0x68] sm:$0xff]  ;;  %v86_v4 = vld [vmem:[%s687_s3 + $0x60] sm:$0xff]  ;;  %v85_v5 = vld [vmem:[%s687_s3 + $0x58] sm:$0xff]  ;;  %s513_s28 = smov [#allocation8]   ;;  %vm367_vm4 = vcmask 57344  }
   0xf   :  { %398 = vset.pattern.permute.xlu1 %v512_v2  ;;  %399 = vset.pattern.permute.xlu2 %v512_v2  ;;  %v131_v6 = vld [vmem:[%s690_s6] sm:$0xff]  ;;  %v84_v7 = vld [vmem:[%s687_s3 + $0x50] sm:$0xff]  ;;  %v83_v8 = vld [vmem:[%s687_s3 + $0x48] sm:$0xff] }
  0x10   :  { %95 = vmatpush.msra.mxu0 %v88_v1  ;;  %149 = vperm.xlu0 %397, %v131_v6   ;;  %v82_v9 = vld [vmem:[%s687_s3 + $0x40] sm:$0xff]  ;;  %v81_v10 = vld [vmem:[%s687_s3 + $0x38] sm:$0xff]  ;;  %v80_v11 = vld [vmem:[%s687_s3 + $0x30] sm:$0xff] }
  0x11   :  { %v79_v12 = vld [vmem:[%s687_s3 + $0x28] sm:$0xff]  ;;  %v78_v13 = vld [vmem:[%s687_s3 + $0x20] sm:$0xff]  ;;  %v77_v16 = vld [vmem:[%s687_s3 + $0x18] sm:$0xff] }
  0x12   :  { %96 = vmatpush.msra.mxu0 %v87_v3  ;;  %v70_v14 = vld [vmem:[#allocation2] sm:$0xff]  ;;  %v71_v15 = vld [vmem:[#allocation5] sm:$0xff]  ;;  %v76_v17 = vld [vmem:[%s687_s3 + $0x10] sm:$0xff] }
  0x13   :  { %v72_v18 = vmul.f32 %v71_v15, %v70_v14  ;;  %v75_v19 = vld [vmem:[%s687_s3 + $0x8] sm:$0xff]  ;;  %v74_v20 = vld [vmem:[%s687_s3] sm:$0xff]  ;;  %v133_v23 = vld [vmem:[%s690_s6 + $0x10] sm:$0xff]  ;;  %s374_s3 = sshll.u32 %s513_s28, 4  ;;  %s375_s3 = int_to_ptr.vmem [resolvable:$true] %s374_s3 }
  0x14   :  { %97 = vmatpush.msra.mxu0 %v86_v4  ;;  %v132_v22 = vld [vmem:[%s690_s6 + $0x8] sm:$0xff]  ;;  %159 = vperm.xlu1 %398, %v133_v23   ;;  %v137_v24 = vld [vmem:[%s690_s6 + $0x30] sm:$0xff]  ;;  %v134_v25 = vld [vmem:[%s690_s6 + $0x18] sm:$0xff] }
  0x15   :  { %v73_v21 = vmax.f32 %v72_v18, 0.0  ;;  %v140_v26 = vld [vmem:[%s690_s6 + $0x48] sm:$0xff]  ;;  %v138_v27 = vld [vmem:[%s690_s6 + $0x38] sm:$0xff]  ;;  %v143_v28 = vld [vmem:[%s690_s6 + $0x60] sm:$0xff] }
  0x16   :  { %98 = vmatpush.msra.mxu0 %v85_v5  ;;  %v141_v29 = vld [vmem:[%s690_s6 + $0x50] sm:$0xff]  ;;  %v400_v30 = vld [vmem:[%s688_s4] ss:$0 sm:$0xff]  ;;  %v146_v34 = vld [vmem:[%s690_s6 + $0x78] sm:$0xff] }
  0x17   :  { %v135_v33 = vld [vmem:[%s690_s6 + $0x20] sm:$0xff]  ;;  %v144_v36 = vld [vmem:[%s690_s6 + $0x68] sm:$0xff]  ;;  %v115_v37 = vld [vmem:[#allocation7] sm:$0xff] }
  0x18   :  { %99 = vmatpush.msra.mxu0 %v84_v7  ;;  %154 = vperm.xlu0 %397, %v132_v22   ;;  %v120_v38 = vld [vmem:[#allocation7 + $0x28] sm:$0xff]  ;;  %v126_v39 = vld [vmem:[#allocation7 + $0x58] sm:$0xff]  ;;  %v121_v42 = vld [vmem:[#allocation7 + $0x30] sm:$0xff] }
  0x19   :  { %169 = vperm.xlu2 %399, %v135_v33   ;;  %v136_v40 = vld [vmem:[%s690_s6 + $0x28] sm:$0xff]  ;;  %v116_v41 = vld [vmem:[#allocation7 + $0x8] sm:$0xff]  ;;  %v127_v43 = vld [vmem:[#allocation7 + $0x60] sm:$0xff] }
  0x1a   :  { %100 = vmatpush.msra.mxu0 %v83_v8  ;;  %v139_v44 = vld [vmem:[%s690_s6 + $0x40] sm:$0xff]  ;;  %v122_v46 = vld [vmem:[#allocation7 + $0x38] sm:$0xff]  ;;  %v128_v47 = vld [vmem:[#allocation7 + $0x68] sm:$0xff] }
  0x1b   :  { %v117_v45 = vld [vmem:[#allocation7 + $0x10] sm:$0xff]  ;;  %v142_v48 = vld [vmem:[%s690_s6 + $0x58] sm:$0xff]  ;;  %v118_v49 = vld [vmem:[#allocation7 + $0x18] sm:$0xff] }
  0x1c   :  { %101 = vmatpush.msra.mxu0 %v82_v9  ;;  %164 = vperm.xlu1 %398, %v134_v25   ;;  %v123_v50 = vld [vmem:[#allocation7 + $0x40] sm:$0xff]  ;;  %v129_v51 = vld [vmem:[#allocation7 + $0x70] sm:$0xff]  ;;  %v124_v54 = vld [vmem:[#allocation7 + $0x48] sm:$0xff] }
  0x1d   :  { %v145_v52 = vld [vmem:[%s690_s6 + $0x70] sm:$0xff]  ;;  %v130_v55 = vld [vmem:[#allocation7 + $0x78] sm:$0xff]  ;;  %v125_v56 = vld [vmem:[#allocation7 + $0x50] sm:$0xff] }
  0x1e   :  { %102 = vmatpush.msra.mxu0 %v81_v10  ;;  %v119_v53 = vld [vmem:[#allocation7 + $0x20] sm:$0xff] }
  0x20   :  { %103 = vmatpush.msra.mxu0 %v80_v11  ;;  %179 = vperm.xlu0 %397, %v137_v24  }
  0x21   :  { %174 = vperm.xlu2 %399, %v136_v40  }
  0x22   :  { %104 = vmatpush.msra.mxu0 %v79_v12 }
  0x24   :  { %105 = vmatpush.msra.mxu0 %v78_v13  ;;  %184 = vperm.xlu1 %398, %v138_v27  }
  0x26   :  { %106 = vmatpush.msra.mxu0 %v77_v16 }
  0x28   :  { %107 = vmatpush.msra.mxu0 %v76_v17  ;;  %194 = vperm.xlu0 %397, %v140_v26  }
  0x29   :  { %189 = vperm.xlu2 %399, %v139_v44  }
  0x2a   :  { %108 = vmatpush.msra.mxu0 %v75_v19 }
  0x2c   :  { %109 = vmatpush.msra.mxu0 %v74_v20  ;;  %199 = vperm.xlu1 %398, %v141_v29  }
  0x2d   :  { %110 = vmatmul.f32.vlgmr.msra.gmra.mxu0 %v73_v21 }
  0x30   :  { %209 = vperm.xlu0 %397, %v143_v28  }
  0x31   :  { %204 = vperm.xlu2 %399, %v142_v48  }
  0x34   :  { %214 = vperm.xlu1 %398, %v144_v36  }
  0x38   :  { %224 = vperm.xlu0 %397, %v146_v34  }
  0x39   :  { %219 = vperm.xlu2 %399, %v145_v52  }
  0x73   :  { %v170_v62 = vpop.permute.xlu2 %169 }
  0x7b   :  { %v175_v4 = vpop.permute.xlu2 %174 }
  0x82   :  { %v150_v58 = vpop.permute.xlu0 %149 }
  0x83   :  { %v190_v17 = vpop.permute.xlu2 %189 }
  0x86   :  { %v160_v60 = vpop.permute.xlu1 %159 }
  0x8a   :  { %v155_v0 = vpop.permute.xlu0 %154 }
  0x8b   :  { %v205_v44 = vpop.permute.xlu2 %204 }
  0x8e   :  { %v165_v3 = vpop.permute.xlu1 %164 }
  0x92   :  { %v180_v7 = vpop.permute.xlu0 %179 }
  0x96   :  { %v185_v16 = vpop.permute.xlu1 %184 }
  0x9a   :  { %v195_v25 = vpop.permute.xlu0 %194 }
  0xaa   :  { %v111_v31 = vpop.f32.mrf.mxu0 }
  0xab   :  { %v112_v32 = vadd.f32 %v400_v30, %v111_v31 }
  0xad   :  { %v114_v35 = vmax.f32 %v112_v32, 0.0 }
  0xaf   :  { %242 = vmatpush.xpose.msra.mxu1 %v114_v35  ;;  %388 = vmatpush.xpose.msra.mxu2 %v114_v35 }
  0xb0   :  { %389 = vmatpush.xpose.msra.mxu3 %v114_v35 }
  0xb2   :  { %243 = vmatmul.f32.vlgmr.msra.gmra.mxu1 %v115_v37  ;;  %258 = vmatmul.f32.vlgmr.msra.gmra.mxu2 %v120_v38 }
  0xb3   :  { %276 = vmatmul.f32.vlgmr.msra.gmra.mxu3 %v126_v39  ;;  %v200_v39 = vpop.permute.xlu1 %199 }
  0xba   :  { %246 = vmatmul.f32.gmra.mxu1 %v116_v41  ;;  %261 = vmatmul.f32.gmra.mxu2 %v121_v42 }
  0xbb   :  { %279 = vmatmul.f32.gmra.mxu3 %v127_v43 }
  0xc2   :  { %249 = vmatmul.f32.gmra.mxu1 %v117_v45  ;;  %264 = vmatmul.f32.gmra.mxu2 %v122_v46 }
  0xc3   :  { %282 = vmatmul.f32.gmra.mxu3 %v128_v47 }
  0xca   :  { %252 = vmatmul.f32.gmra.mxu1 %v118_v49  ;;  %267 = vmatmul.f32.gmra.mxu2 %v123_v50  ;;  %v210_v50 = vpop.permute.xlu0 %209 }
  0xcb   :  { %285 = vmatmul.f32.gmra.mxu3 %v129_v51 }
  0xd2   :  { %255 = vmatmul.f32.gmra.mxu1 %v119_v53  ;;  %270 = vmatmul.f32.gmra.mxu2 %v124_v54 }
  0xd3   :  { %288 = vmatmul.f32.gmra.mxu3 %v130_v55 }
  0xda   :  { %273 = vmatmul.f32.gmra.mxu2 %v125_v56 }
 0x12f   :  { %v244_v57 = vpop.f32.mrf.mxu1 }
 0x130   :  { %v245_v9 = vadd.f32 %v244_v57, %v150_v58 }
 0x132   :  { %v292_v14 = vmax.f32 %v245_v9, 0.0  ;;  %v225_v9 = vpop.permute.xlu0 %224 }
 0x134   :  { %v309_v22 = vsel %vm308_vm0, %v292_v14, 0.0 }
 0x135   :  { %v259_v59 = vpop.f32.mrf.mxu2 }
 0x136   :  { %v277_v63 = vpop.f32.mrf.mxu3  ;;  %v260_v23 = vadd.f32 %v259_v59, %v175_v4 }
 0x137   :  { %v247_v61 = vpop.f32.mrf.mxu1  ;;  %v278_v54 = vadd.f32 %v277_v63, %v205_v44 }
 0x138   :  { %v248_v6 = vadd.f32 %v247_v61, %v155_v0  ;;  %v297_v32 = vmax.f32 %v260_v23, 0.0  ;;  %v215_v61 = vpop.permute.xlu1 %214 }
 0x13a   :  { %v293_v12 = vmax.f32 %v248_v6, 0.0  ;;  %v318_v42 = vsel %vm308_vm0, %v297_v32, 0.0 }
 0x13c   :  { %v310_v18 = vsel %vm308_vm0, %v293_v12, 0.0 }
 0x13d   :  { %v262_v1 = vpop.f32.mrf.mxu2  ;;  %v311_v26 = vadd.f32 %v310_v18, %v309_v22 }
 0x13e   :  { %v280_v5 = vpop.f32.mrf.mxu3  ;;  %v263_v28 = vadd.f32 %v262_v1, %v180_v7 }
 0x13f   :  { %v250_v2 = vpop.f32.mrf.mxu1  ;;  %v281_v59 = vadd.f32 %v280_v5, %v210_v50 }
 0x140   :  { %v251_v10 = vadd.f32 %v250_v2, %v160_v60  ;;  %v298_v36 = vmax.f32 %v263_v28, 0.0 }
 0x141   :  { %v304_v7 = vmax.f32 %v281_v59, 0.0 }
 0x142   :  { %v294_v15 = vmax.f32 %v251_v10, 0.0  ;;  %v320_v47 = vsel %vm308_vm0, %v298_v36, 0.0 }
 0x143   :  { %v332_v14 = vsel %vm308_vm0, %v304_v7, 0.0 }
 0x144   :  { %v312_v24 = vsel %vm308_vm0, %v294_v15, 0.0 }
 0x145   :  { %v265_v8 = vpop.f32.mrf.mxu2  ;;  %v313_v31 = vadd.f32 %v312_v24, %v311_v26 }
 0x146   :  { %v283_v20 = vpop.f32.mrf.mxu3  ;;  %v266_v33 = vadd.f32 %v265_v8, %v185_v16 }
 0x147   :  { %v253_v11 = vpop.f32.mrf.mxu1  ;;  %v284_v0 = vadd.f32 %v283_v20, %v215_v61 }
 0x148   :  { %v254_v13 = vadd.f32 %v253_v11, %v165_v3  ;;  %v299_v43 = vmax.f32 %v266_v33, 0.0  ;;  %v220_v3 = vpop.permute.xlu2 %219 }
 0x149   :  { %v305_v12 = vmax.f32 %v284_v0, 0.0 }
 0x14a   :  { %v295_v19 = vmax.f32 %v254_v13, 0.0  ;;  %v322_v52 = vsel %vm308_vm0, %v299_v43, 0.0 }
 0x14c   :  { %v314_v29 = vsel %vm308_vm0, %v295_v19, 0.0 }
 0x14d   :  { %v268_v21 = vpop.f32.mrf.mxu2  ;;  %v315_v35 = vadd.f32 %v314_v29, %v313_v31  ;;  %v346_v29 = vld [vmem:[%s686_s2] sm:$0x1]  ;;  %s376_s2 = sshll.u32 %s691_s7, 4  ;;  %s377_s2 = int_to_ptr.hbm [resolvable:$true] %s376_s2 }
 0x14e   :  { %v269_v37 = vadd.f32 %v268_v21, %v190_v17  ;;  %v286_v45 = vpop.f32.mrf.mxu3  ;;  %v334_v17 = vsel %vm308_vm0, %v305_v12, 0.0 }
 0x14f   :  { %v256_v27 = vpop.f32.mrf.mxu1  ;;  %v287_v8 = vadd.f32 %v286_v45, %v220_v3 }
 0x150   :  { %v257_v30 = vadd.f32 %v256_v27, %v170_v62  ;;  %v300_v48 = vmax.f32 %v269_v37, 0.0  ;;  %v303_v62 = vmax.f32 %v278_v54, 0.0 }
 0x151   :  { %v306_v15 = vmax.f32 %v287_v8, 0.0 }
 0x152   :  { %v296_v34 = vmax.f32 %v257_v30, 0.0  ;;  %v324_v55 = vsel %vm308_vm0, %v300_v48, 0.0  ;;  %v330_v11 = vsel %vm308_vm0, %v303_v62, 0.0 }
 0x153   :  { %v336_v20 = vsel %vm308_vm0, %v306_v15, 0.0 }
 0x154   :  { %v316_v38 = vsel %vm308_vm0, %v296_v34, 0.0 }
 0x155   :  { %v317_v40 = vadd.f32 %v316_v38, %v315_v35  ;;  %v271_v41 = vpop.f32.mrf.mxu2 }
 0x156   :  { %v272_v49 = vadd.f32 %v271_v41, %v195_v25  ;;  %v289_v6 = vpop.f32.mrf.mxu3 }
 0x157   :  { %v319_v46 = vadd.f32 %v318_v42, %v317_v40  ;;  %v290_v5 = vadd.f32 %v289_v6, %v225_v9 }
 0x158   :  { %v301_v56 = vmax.f32 %v272_v49, 0.0 }
 0x159   :  { %v321_v51 = vadd.f32 %v320_v47, %v319_v46  ;;  %v307_v18 = vmax.f32 %v290_v5, 0.0 }
 0x15a   :  { %v326_v1 = vsel %vm308_vm0, %v301_v56, 0.0 }
 0x15b   :  { %v323_v53 = vadd.f32 %v322_v52, %v321_v51  ;;  %v338_v22 = vsel %vm308_vm0, %v307_v18, 0.0 }
 0x15d   :  { %v325_v57 = vadd.f32 %v324_v55, %v323_v53  ;;  %v274_v58 = vpop.f32.mrf.mxu2 }
 0x15e   :  { %v275_v60 = vadd.f32 %v274_v58, %v200_v39 }
 0x15f   :  { %v327_v4 = vadd.f32 %v326_v1, %v325_v57 }
 0x160   :  { %v302_v2 = vmax.f32 %v275_v60, 0.0 }
 0x162   :  { %v328_v63 = vsel %vm308_vm0, %v302_v2, 0.0 }
 0x163   :  { %v329_v10 = vadd.f32 %v328_v63, %v327_v4 }
 0x165   :  { %v331_v13 = vadd.f32 %v330_v11, %v329_v10 }
 0x167   :  { %v333_v16 = vadd.f32 %v332_v14, %v331_v13 }
 0x169   :  { %v335_v19 = vadd.f32 %v334_v17, %v333_v16 }
 0x16b   :  { %v337_v21 = vadd.f32 %v336_v20, %v335_v19 }
 0x16d   :  { %v339_v23 = vadd.f32 %v338_v22, %v337_v21 }
 0x16f   :  { %v340_v24 = vrot.slane %v339_v23, 4 }
 0x171   :  { %v341_v25 = vadd.f32 %v340_v24, %v339_v23 }
 0x173   :  { %v342_v26 = vrot.slane %v341_v25, 2 }
 0x175   :  { %v343_v27 = vadd.f32 %v342_v26, %v341_v25 }
 0x177   :  { %v344_v28 = vrot.slane %v343_v27, 1 }
 0x179   :  { %v345_v30 = vadd.f32 %v344_v28, %v343_v27 }
 0x17b   :  { %v347_v31 = vadd.f32 %v346_v29, %v345_v30 }
 0x17d   :  { %v387_v32 = vmul.f32 -1.442695, %v347_v31 }
 0x17f   :  { %401 = vpow2.f32 %v387_v32 }
 0x185   :  { %v402_v33 = vpop.eup %401 }
 0x186   :  { %v351_v34 = vadd.f32 1.0, %v402_v33 }
 0x188   :  { %403 = vrcp.f32 %v351_v34  ;;  %v363_v38 = vand.u32 2147483648, %v351_v34  ;;  %v361_v40 = vand.u32 2147483647, %v351_v34  ;;  %vm357_vm2 = vweird.f32 %v351_v34 }
 0x18a   :  { %v364_v42 = vor.u32 1.1754944e-38, %v363_v38  ;;  %vm362_vm5 = vcmp.eq.f32.partialorder %v361_v40, 8.507059e+37 }
 0x18e   :  { %v404_v35 = vpop.eup %403 }
 0x18f   :  { %v353_v36 = vmul.f32 %v404_v35, %v351_v34  ;;  %vm358_vm1 = vweird.f32 %v404_v35 }
 0x190   :  { %vm359_vm3 = vmor %vm357_vm2, %vm358_vm1 }
 0x191   :  { %v354_v37 = vsub.f32 1.0, %v353_v36 }
 0x193   :  { %v355_v39 = vmul.f32 %v404_v35, %v354_v37 }
 0x195   :  { %v356_v41 = vadd.f32 %v404_v35, %v355_v39 }
 0x197   :  { %v360_v43 = vsel %vm359_vm3, %v404_v35, %v356_v41 }
 0x198   :  { %v365_v44 = vsel %vm362_vm5, %v364_v42, %v360_v43 }
 0x199   :  { %368 = vst.msk [vmem:[#allocation8] sm:$0x1] %vm367_vm4, %v365_v44 }
 0x19a   :  { %379 = dma.vmem_to_hbm [thread:$0]  %s375_s3, 16, %s377_s2, [#allocation4]  }
 0x19b   :  { %505 = dma.done.wait [#allocation4], 16  }
 0x19c   :  { %506 = vsyncadd [#allocation4], 4294967280 }
 0x19d   :  { %384 = vsyncpa [#allocation3], 1 }
 0x19e   :  { %385 = vsyncpa [#allocation6], 1 }
 0x19f   :  { %386 = vsyncpa [#allocation4], 1 }

</bundles_post_ra>
